<compile_context>
chip_gen: v7x
topology: tpu7x:2x2x1
jax: 0.10.0
libtpu: 0.0.40
codegen_flags: <defaults>
</compile_context>

<pallas_src>
import jax
import jax.numpy as jnp
from jax import lax
from jax.experimental import pallas as pl
from jax.experimental.pallas import tpu as pltpu


# ----------------------------------------------------------------------------- kernel

def _conv1x1_matmul_kernel(x_ref, w_ref, o_ref):
    # x_ref: (TM, Cin) bf16 pixel block; w_ref: (Cin, C) bf16; o_ref: (TM, C) f32.
    o_ref[...] = jnp.dot(x_ref[...], w_ref[...],
                         preferred_element_type=jnp.float32)


def _conv1x1_matmul(x_flat, w_mat, *, block_rows=512):
    """(M, Cin) @ (Cin, C) -> (M, C) f32, tiled over pixel-row blocks."""
    M, cin = x_flat.shape
    C = w_mat.shape[1]
    tm = min(block_rows, M)              # tm == M (full dim) or a multiple of 8
    grid = (pl.cdiv(M, tm),)             # ragged last block handled by Pallas masking
    cost = pl.CostEstimate(
        flops=2 * M * cin * C,
        transcendentals=0,
        bytes_accessed=M * cin * 2 + cin * C * 2 + M * C * 4)
    return pl.pallas_call(
        _conv1x1_matmul_kernel,
        out_shape=jax.ShapeDtypeStruct((M, C), jnp.float32),
        grid=grid,
        in_specs=[pl.BlockSpec((tm, cin), lambda i: (i, 0)),
                  pl.BlockSpec((cin, C), lambda i: (0, 0))],   # weight resident
        out_specs=pl.BlockSpec((tm, C), lambda i: (i, 0)),
        compiler_params=pltpu.CompilerParams(
            dimension_semantics=("parallel",),
            vmem_limit_bytes=32 * 1024 * 1024),
        cost_estimate=cost,
    )(x_flat, w_mat)


# ----------------------------------------------------------------------------- wrapper

def dupsampling_forward(x_nchw, w_conv, *, scale, num_class, block_rows=512):
    """DUpsampling.forward.

    x_nchw: (N, Cin, H, W) float32 (PyTorch layout at the boundary).
    w_conv: (C, Cin) with C = num_class*scale*scale  (conv1.weight squeezed of its
            trailing 1x1 spatial dims; bias=False in the module).
    Returns (N, num_class, H*scale, W*scale) float32.
    """
    N, cin, H, W = x_nchw.shape
    C = num_class * scale * scale
    assert w_conv.shape == (C, cin), (w_conv.shape, (C, cin))

    # Boundary layout: NCHW -> NHWC so the contraction dim sits on the lane axis;
    # reshape to a flat (pixels, Cin) matrix (free), cast to bf16 for the MXU.
    x_flat = (jnp.transpose(x_nchw, (0, 2, 3, 1))
              .reshape(N * H * W, cin)
              .astype(jnp.bfloat16))
    w_mat = jnp.transpose(w_conv, (1, 0)).astype(jnp.bfloat16)      # (Cin, C)

    y = _conv1x1_matmul(x_flat, w_mat, block_rows=block_rows)       # (N*H*W, C) f32

    # Depth-to-space exactly as the PyTorch view/permute chain:
    #   c = sw*(num_class*scale) + sh*num_class + k
    #   out[n, k, h*scale+sh, w*scale+sw] = conv[n, c, h, w]
    y6 = y.reshape(N, H, W, scale, scale, num_class)       # (n, h, w, sw, sh, k)
    out = jnp.transpose(y6, (0, 5, 1, 4, 2, 3))            # (n, k, h, sh, w, sw)
    return out.reshape(N, num_class, H * scale, W * scale)  # merge -> NCHW


# ----------------------------------------------------------------------------- reference (pure JAX, mirrors PyTorch op-for-op)

def ref_dupsampling(x_nchw, w_conv, *, scale, num_class):
    N, cin, H, W = x_nchw.shape
    C = num_class * scale * scale
    hi = lax.Precision.HIGHEST
    x = jnp.einsum('oc,nchw->nohw', w_conv.astype(jnp.float32),
                   x_nchw.astype(jnp.float32), precision=hi)         # 1x1 conv, no bias
    xp = jnp.transpose(x, (0, 2, 3, 1))                               # permute(0,2,3,1)
    xp = xp.reshape(N, H, W * scale, C // scale)                      # view
    xp = jnp.transpose(xp, (0, 2, 1, 3))                              # permute(0,2,1,3)
    xp = xp.reshape(N, W * scale, H * scale, C // (scale * scale))    # view
    return jnp.transpose(xp, (0, 3, 2, 1))                            # permute(0,3,2,1)


# ----------------------------------------------------------------------------- main

if __name__ == "__main__":
    N, inplanes, H, W = 4, 32, 16, 16
    scale, num_class = 2, 21
    C = num_class * scale * scale

    key = jax.random.PRNGKey(0)
    kx, kw = jax.random.split(key)
    x = jax.random.normal(kx, (N, inplanes, H, W), jnp.float32)
    w = 0.05 * jax.random.normal(kw, (C, inplanes), jnp.float32)

    # Round both operands to bf16-representable values once, so the MXU (bf16) path
    # and the f32 reference compute identical products (only summation order differs).
    x = x.astype(jnp.bfloat16).astype(jnp.float32)
    w = w.astype(jnp.bfloat16).astype(jnp.float32)

    out = dupsampling_forward(x, w, scale=scale, num_class=num_class)
    out = jax.block_until_ready(out)

    ref = ref_dupsampling(x, w, scale=scale, num_class=num_class)
    assert out.shape == (N, num_class, H * scale, W * scale), out.shape
    err = float(jnp.max(jnp.abs(out - ref)))
    assert bool(jnp.allclose(out, ref, rtol=1e-3, atol=1e-3)), f"max abs err = {err}"
    print("KERNEL_OK")
</pallas_src>

<mosaic_0001>
module attributes {stable_mosaic.version = 11 : i64} {
  func.func @_conv1x1_matmul_kernel(%arg0: i32, %arg1: memref<512x32xbf16, #tpu.memory_space<vmem>>, %arg2: memref<32x84xbf16, #tpu.memory_space<vmem>>, %arg3: memref<512x84xf32, #tpu.memory_space<vmem>>) attributes {dimension_semantics = [#tpu.dimension_semantics<parallel>], iteration_bounds = array<i64: 2>, scalar_prefetch = 0 : i64, scratch_operands = 0 : i64, tpu.core_type = #tpu.core_type<tc>, window_params = [{transform_indices = @transform_0, window_bounds = array<i64: 512, 32>}, {pipeline_mode = #tpu.pipeline_mode<synchronous>, transform_indices = @transform_1, window_bounds = array<i64: 32, 84>}, {transform_indices = @transform_2, window_bounds = array<i64: 512, 84>}]} {
    %c0 = arith.constant 0 : index
    %c0_0 = arith.constant 0 : index
    %0 = vector.load %arg1[%c0, %c0_0] : memref<512x32xbf16, #tpu.memory_space<vmem>>, vector<512x32xbf16>
    %c0_1 = arith.constant 0 : index
    %c0_2 = arith.constant 0 : index
    %1 = vector.load %arg2[%c0_1, %c0_2] : memref<32x84xbf16, #tpu.memory_space<vmem>>, vector<32x84xbf16>
    %cst = arith.constant dense<0.000000e+00> : vector<512x84xf32>
    %2 = tpu.matmul %0, %1, %cst {dimension_numbers = #tpu.dot_dimension_numbers<[1], [0], [0], [1], [0, 0, 1, 1], [], []>} : vector<512x32xbf16>, vector<32x84xbf16>, vector<512x84xf32> -> vector<512x84xf32>
    %c0_3 = arith.constant 0 : index
    %c0_4 = arith.constant 0 : index
    %3 = vector.load %arg3[%c0_3, %c0_4] : memref<512x84xf32, #tpu.memory_space<vmem>>, vector<512x84xf32>
    tpu.vector_store %arg3[%c0_3, %c0_4], %2 {strides = array<i32>} : memref<512x84xf32, #tpu.memory_space<vmem>>, vector<512x84xf32>,
    return
  }
  func.func @transform_0(%arg0: i32) -> (i32, i32) {
    %c0_i32 = arith.constant 0 : i32
    %c0_i32_0 = arith.constant 0 : i32
    return %arg0, %c0_i32 : i32, i32
  }
  func.func @transform_1(%arg0: i32) -> (i32, i32) {
    %c0_i32 = arith.constant 0 : i32
    %c0_i32_0 = arith.constant 0 : i32
    %c0_i32_1 = arith.constant 0 : i32
    return %c0_i32, %c0_i32_0 : i32, i32
  }
  func.func @transform_2(%arg0: i32) -> (i32, i32) {
    %c0_i32 = arith.constant 0 : i32
    %c0_i32_0 = arith.constant 0 : i32
    return %arg0, %c0_i32 : i32, i32
  }
}

</mosaic_0001>

<bundles_post_ra>
// kernel: tpu_custom_call.1
= control target key start
LH: loop header
LB: loop body
LE: loop exit
PB: predicated region body
PF: predicated region fallthrough
CT: control target
= control target key end

     0   :  { %s1143_s9 = smov 0   ;;  %s1366_s0 = inlined_call_operand.vmem [shape: bf16[1024,32], index: 0, kind: input, shape index: {}]   ;;  %s1367_s1 = inlined_call_operand.vmem [shape: bf16[32,84], index: 1, kind: input, shape index: {}]   ;;  %s1368_s2 = inlined_call_operand.vmem [shape: f32[1024,84], index: 2, kind: output, shape index: {}]  }
   0x1 LB: > { %s895_s10 = sadd.s32 4294967295, %s1126_s9   ;;  %p899_p0 = scmp.ge.s32.totalorder %s1126_s9, 1  ;;  %s1126_s9 = sphi %s1143_s9, %s12_s9  }
   0x2   : > { %p113_p1 = scmp.lt.s32.totalorder %s1126_s9, 3 }
   0x4   : > { %p114_p2 = pnand %p899_p0, %p113_p1 }
   0x5   : > { %v1086_v0 = vld [vmem:[%s1367_s1] sm:$0xff] (!%p114_p2)   ;;  %s900_s13 = sshll.u32 (!%p114_p2), %s895_s10, 6  ;;  %v1087_v1 = vld [vmem:[%s1367_s1 + $0x8] sm:$0xff] (!%p114_p2)   ;;  %vm388_vm0 = vcmask (!%p114_p2), 261120   ;;  %vm774_vm1 = vcmask (!%p114_p2), 687104  }
   0x6   : > { %117 = sbr.rel (%p114_p2) target bundleno = 291 (0x123), region = 28  ;;  %p136_p3 = scmp.lt.s32.totalorder (!%p114_p2), %s900_s13, 127  ;;  %1006 = vmatprep.subr.bf16.mxu0 (!%p114_p2), %v1086_v0  ;;  %1074 = vmatprep.subr.bf16.mxu1 (!%p114_p2), %v1086_v0 }
   0x7   : > { %1007 = vmatpush3.bf16.msra.mxu0 (!%p114_p2), %v1086_v0  ;;  %1076 = vmatpush3.bf16.msra.mxu1 (!%p114_p2), %v1086_v0 }
   0x8   : > { %1008 = vmatprep.subr.bf16.mxu0 (!%p114_p2), %v1087_v1  ;;  %1075 = vmatprep.subr.bf16.mxu1 (!%p114_p2), %v1087_v1 }
   0xb   : > { %1009 = vmatpush3.bf16.msra.mxu0 (!%p114_p2), %v1087_v1  ;;  %1077 = vmatpush3.bf16.msra.mxu1 (!%p114_p2), %v1087_v1 }
   0xd   : > { %s1370_s13 = smov (!%p136_p3, %s900_s13), 127 }
   0xe   : > { %s901_s16 = sshll.u32 %s1370_s13, 2  ;;  %s903_s20 = sshll.u32 %s1370_s13, 3 }
   0xf   : > { %s1163_s19 = scalar_lea.vmem %s1366_s0, %s901_s16  ;;  %s1233_s23 = scalar_lea.vmem %s1368_s2, %s903_s20 }
  0x10   : > { %v1088_v2 = vld [vmem:[%s1163_s19] sm:$0xff]   ;;  %v1090_v4 = vld [vmem:[%s1163_s19 + $0x8] sm:$0xff]   ;;  %v1092_v6 = vld [vmem:[%s1163_s19 + $0x10] sm:$0xff]  }
  0x11   : > { %v1089_v3 = vld [vmem:[%s1163_s19 + $0x80] sm:$0xff]   ;;  %1010 = vmatprep.mubr.msk.bf16.mxu0 %vm388_vm0, %v1088_v2  ;;  %v1091_v5 = vld [vmem:[%s1163_s19 + $0x88] sm:$0xff]   ;;  %v1093_v7 = vld [vmem:[%s1163_s19 + $0x90] sm:$0xff]  }
  0x12   : > { %1042 = vmatprep.mubr.msk.bf16.mxu1 %vm388_vm0, %v1089_v3  ;;  %1011 = vmatmul.mubr.msk.bf16.vlgmr.msra.gmra.mrb[0].mxu0 %vm388_vm0, %v1090_v4  ;;  %v1094_v8 = vld [vmem:[%s1163_s19 + $0x18] sm:$0xff]   ;;  %v1096_v10 = vld [vmem:[%s1163_s19 + $0x20] sm:$0xff]   ;;  %v1098_v12 = vld [vmem:[%s1163_s19 + $0x28] sm:$0xff]  }
  0x13   : > { %1043 = vmatmul.mubr.msk.bf16.vlgmr.msra.gmra.mrb[0].mxu1 %vm388_vm0, %v1091_v5  ;;  %1014 = vmatprep.mubr.msk.bf16.mxu0 %vm388_vm0, %v1092_v6  ;;  %v1095_v9 = vld [vmem:[%s1163_s19 + $0x98] sm:$0xff]   ;;  %v1097_v11 = vld [vmem:[%s1163_s19 + $0xa0] sm:$0xff]   ;;  %v1099_v13 = vld [vmem:[%s1163_s19 + $0xa8] sm:$0xff]  }
  0x14   : > { %1046 = vmatprep.mubr.msk.bf16.mxu1 %vm388_vm0, %v1093_v7  ;;  %v1100_v14 = vld [vmem:[%s1163_s19 + $0x30] sm:$0xff]   ;;  %v1102_v16 = vld [vmem:[%s1163_s19 + $0x38] sm:$0xff]   ;;  %v1104_v18 = vld [vmem:[%s1163_s19 + $0x40] sm:$0xff]  }
  0x15   : > { %v1101_v15 = vld [vmem:[%s1163_s19 + $0xb0] sm:$0xff]   ;;  %v1103_v17 = vld [vmem:[%s1163_s19 + $0xb8] sm:$0xff]   ;;  %v1105_v19 = vld [vmem:[%s1163_s19 + $0xc0] sm:$0xff]  }
  0x16   : > { %v1106_v20 = vld [vmem:[%s1163_s19 + $0x48] sm:$0xff]   ;;  %v1108_v22 = vld [vmem:[%s1163_s19 + $0x50] sm:$0xff]   ;;  %v1110_v24 = vld [vmem:[%s1163_s19 + $0x58] sm:$0xff]  }
  0x17   : > { %v1107_v21 = vld [vmem:[%s1163_s19 + $0xc8] sm:$0xff]   ;;  %v1109_v23 = vld [vmem:[%s1163_s19 + $0xd0] sm:$0xff]   ;;  %v1111_v25 = vld [vmem:[%s1163_s19 + $0xd8] sm:$0xff]  }
  0x18   : > { %v1112_v26 = vld [vmem:[%s1163_s19 + $0x60] sm:$0xff]   ;;  %v1114_v28 = vld [vmem:[%s1163_s19 + $0x68] sm:$0xff]   ;;  %v1116_v30 = vld [vmem:[%s1163_s19 + $0x70] sm:$0xff]  }
  0x19   : > { %v1113_v27 = vld [vmem:[%s1163_s19 + $0xe0] sm:$0xff]   ;;  %v1115_v29 = vld [vmem:[%s1163_s19 + $0xe8] sm:$0xff]   ;;  %v1117_v31 = vld [vmem:[%s1163_s19 + $0xf0] sm:$0xff]  }
  0x1a   : > { %1015 = vmatmul.mubr.msk.bf16.gmra.mrb[4].mxu0 %vm388_vm0, %v1094_v8  ;;  %v1118_v32 = vld [vmem:[%s1163_s19 + $0x78] sm:$0xff]  }
  0x1b   : > { %1047 = vmatmul.mubr.msk.bf16.gmra.mrb[4].mxu1 %vm388_vm0, %v1095_v9  ;;  %1018 = vmatprep.mubr.msk.bf16.mxu0 %vm388_vm0, %v1096_v10  ;;  %v1119_v33 = vld [vmem:[%s1163_s19 + $0xf8] sm:$0xff]  }
  0x1c   : > { %1050 = vmatprep.mubr.msk.bf16.mxu1 %vm388_vm0, %v1097_v11 }
  0x22   : > { %1019 = vmatmul.mubr.msk.bf16.gmra.mrb[8].mxu0 %vm388_vm0, %v1098_v12 }
  0x23   : > { %1051 = vmatmul.mubr.msk.bf16.gmra.mrb[8].mxu1 %vm388_vm0, %v1099_v13  ;;  %1022 = vmatprep.mubr.msk.bf16.mxu0 %vm388_vm0, %v1100_v14 }
  0x24   : > { %1054 = vmatprep.mubr.msk.bf16.mxu1 %vm388_vm0, %v1101_v15 }
  0x2a   : > { %1023 = vmatmul.mubr.msk.bf16.gmra.mrb[12].mxu0 %vm388_vm0, %v1102_v16 }
  0x2b   : > { %1055 = vmatmul.mubr.msk.bf16.gmra.mrb[12].mxu1 %vm388_vm0, %v1103_v17  ;;  %1026 = vmatprep.mubr.msk.bf16.mxu0 %vm388_vm0, %v1104_v18 }
  0x2c   : > { %1058 = vmatprep.mubr.msk.bf16.mxu1 %vm388_vm0, %v1105_v19 }
  0x32   : > { %1027 = vmatmul.mubr.msk.bf16.gmra.mrb[16].mxu0 %vm388_vm0, %v1106_v20 }
  0x33   : > { %1059 = vmatmul.mubr.msk.bf16.gmra.mrb[16].mxu1 %vm388_vm0, %v1107_v21  ;;  %1030 = vmatprep.mubr.msk.bf16.mxu0 %vm388_vm0, %v1108_v22 }
  0x34   : > { %1062 = vmatprep.mubr.msk.bf16.mxu1 %vm388_vm0, %v1109_v23 }
  0x3a   : > { %1031 = vmatmul.mubr.msk.bf16.gmra.mrb[20].mxu0 %vm388_vm0, %v1110_v24 }
  0x3b   : > { %1063 = vmatmul.mubr.msk.bf16.gmra.mrb[20].mxu1 %vm388_vm0, %v1111_v25  ;;  %1034 = vmatprep.mubr.msk.bf16.mxu0 %vm388_vm0, %v1112_v26 }
  0x3c   : > { %1066 = vmatprep.mubr.msk.bf16.mxu1 %vm388_vm0, %v1113_v27 }
  0x42   : > { %1035 = vmatmul.mubr.msk.bf16.gmra.mrb[24].mxu0 %vm388_vm0, %v1114_v28 }
  0x43   : > { %1067 = vmatmul.mubr.msk.bf16.gmra.mrb[24].mxu1 %vm388_vm0, %v1115_v29  ;;  %1038 = vmatprep.mubr.msk.bf16.mxu0 %vm388_vm0, %v1116_v30 }
  0x44   : > { %1070 = vmatprep.mubr.msk.bf16.mxu1 %vm388_vm0, %v1117_v31 }
  0x4a   : > { %1039 = vmatmul.mubr.msk.bf16.gmra.mrb[28].mxu0 %vm388_vm0, %v1118_v32 }
  0x4b   : > { %1071 = vmatmul.mubr.msk.bf16.gmra.mrb[28].mxu1 %vm388_vm0, %v1119_v33 }
  0xe5   : > { %v1012_v34 = vpop.f32.mrb[0].mxu0 }
  0xe6   : > { %777 = vst.msk [vmem:[%s1233_s23 + $0x10] sm:$0xff] %vm774_vm1, %v1012_v34  ;;  %v1044_v35 = vpop.f32.mrb[0].mxu1  ;;  %v519_v36 = vpop.f32.mrb[1].mxu0 }
  0xe7   : > { %809 = vst.msk [vmem:[%s1233_s23 + $0x110] sm:$0xff] %vm774_vm1, %v1044_v35  ;;  %775 = vst.msk [vmem:[%s1233_s23] sm:$0xff] %vm774_vm1, %v519_v36  ;;  %v647_v37 = vpop.f32.mrb[1].mxu1  ;;  %v1013_v38 = vpop.f32.mrb[2].mxu0 }
  0xe8   : > { %807 = vst.msk [vmem:[%s1233_s23 + $0x100] sm:$0xff] %vm774_vm1, %v647_v37  ;;  %778 = vst.msk [vmem:[%s1233_s23 + $0x18] sm:$0xff] %vm774_vm1, %v1013_v38  ;;  %v1045_v39 = vpop.f32.mrb[2].mxu1  ;;  %v522_v40 = vpop.f32.mrb[3].mxu0 }
  0xe9   : > { %810 = vst.msk [vmem:[%s1233_s23 + $0x118] sm:$0xff] %vm774_vm1, %v1045_v39  ;;  %776 = vst.msk [vmem:[%s1233_s23 + $0x8] sm:$0xff] %vm774_vm1, %v522_v40  ;;  %v650_v41 = vpop.f32.mrb[3].mxu1 }
  0xea   : > { %808 = vst.msk [vmem:[%s1233_s23 + $0x108] sm:$0xff] %vm774_vm1, %v650_v41 }
  0xed   : > { %v1016_v42 = vpop.f32.mrb[4].mxu0 }
  0xee   : > { %781 = vst.msk [vmem:[%s1233_s23 + $0x30] sm:$0xff] %vm774_vm1, %v1016_v42  ;;  %v1048_v43 = vpop.f32.mrb[4].mxu1  ;;  %v535_v44 = vpop.f32.mrb[5].mxu0 }
  0xef   : > { %813 = vst.msk [vmem:[%s1233_s23 + $0x130] sm:$0xff] %vm774_vm1, %v1048_v43  ;;  %779 = vst.msk [vmem:[%s1233_s23 + $0x20] sm:$0xff] %vm774_vm1, %v535_v44  ;;  %v663_v45 = vpop.f32.mrb[5].mxu1  ;;  %v1017_v46 = vpop.f32.mrb[6].mxu0 }
  0xf0   : > { %811 = vst.msk [vmem:[%s1233_s23 + $0x120] sm:$0xff] %vm774_vm1, %v663_v45  ;;  %782 = vst.msk [vmem:[%s1233_s23 + $0x38] sm:$0xff] %vm774_vm1, %v1017_v46  ;;  %v1049_v47 = vpop.f32.mrb[6].mxu1  ;;  %v538_v48 = vpop.f32.mrb[7].mxu0 }
  0xf1   : > { %814 = vst.msk [vmem:[%s1233_s23 + $0x138] sm:$0xff] %vm774_vm1, %v1049_v47  ;;  %780 = vst.msk [vmem:[%s1233_s23 + $0x28] sm:$0xff] %vm774_vm1, %v538_v48  ;;  %v666_v49 = vpop.f32.mrb[7].mxu1 }
  0xf2   : > { %812 = vst.msk [vmem:[%s1233_s23 + $0x128] sm:$0xff] %vm774_vm1, %v666_v49 }
  0xf5   : > { %v1020_v50 = vpop.f32.mrb[8].mxu0 }
  0xf6   : > { %785 = vst.msk [vmem:[%s1233_s23 + $0x50] sm:$0xff] %vm774_vm1, %v1020_v50  ;;  %v1052_v51 = vpop.f32.mrb[8].mxu1  ;;  %v551_v52 = vpop.f32.mrb[9].mxu0 }
  0xf7   : > { %817 = vst.msk [vmem:[%s1233_s23 + $0x150] sm:$0xff] %vm774_vm1, %v1052_v51  ;;  %783 = vst.msk [vmem:[%s1233_s23 + $0x40] sm:$0xff] %vm774_vm1, %v551_v52  ;;  %v679_v53 = vpop.f32.mrb[9].mxu1  ;;  %v1021_v54 = vpop.f32.mrb[10].mxu0 }
  0xf8   : > { %815 = vst.msk [vmem:[%s1233_s23 + $0x140] sm:$0xff] %vm774_vm1, %v679_v53  ;;  %786 = vst.msk [vmem:[%s1233_s23 + $0x58] sm:$0xff] %vm774_vm1, %v1021_v54  ;;  %v1053_v55 = vpop.f32.mrb[10].mxu1  ;;  %v554_v56 = vpop.f32.mrb[11].mxu0 }
  0xf9   : > { %818 = vst.msk [vmem:[%s1233_s23 + $0x158] sm:$0xff] %vm774_vm1, %v1053_v55  ;;  %784 = vst.msk [vmem:[%s1233_s23 + $0x48] sm:$0xff] %vm774_vm1, %v554_v56  ;;  %v682_v57 = vpop.f32.mrb[11].mxu1 }
  0xfa   : > { %816 = vst.msk [vmem:[%s1233_s23 + $0x148] sm:$0xff] %vm774_vm1, %v682_v57 }
  0xfd   : > { %v1024_v58 = vpop.f32.mrb[12].mxu0 }
  0xfe   : > { %789 = vst.msk [vmem:[%s1233_s23 + $0x70] sm:$0xff] %vm774_vm1, %v1024_v58  ;;  %v1056_v59 = vpop.f32.mrb[12].mxu1  ;;  %v567_v60 = vpop.f32.mrb[13].mxu0 }
  0xff   : > { %821 = vst.msk [vmem:[%s1233_s23 + $0x170] sm:$0xff] %vm774_vm1, %v1056_v59  ;;  %787 = vst.msk [vmem:[%s1233_s23 + $0x60] sm:$0xff] %vm774_vm1, %v567_v60  ;;  %v695_v61 = vpop.f32.mrb[13].mxu1  ;;  %v1025_v62 = vpop.f32.mrb[14].mxu0 }
 0x100   : > { %819 = vst.msk [vmem:[%s1233_s23 + $0x160] sm:$0xff] %vm774_vm1, %v695_v61  ;;  %790 = vst.msk [vmem:[%s1233_s23 + $0x78] sm:$0xff] %vm774_vm1, %v1025_v62  ;;  %v1057_v63 = vpop.f32.mrb[14].mxu1  ;;  %v570_v0 = vpop.f32.mrb[15].mxu0 }
 0x101   : > { %822 = vst.msk [vmem:[%s1233_s23 + $0x178] sm:$0xff] %vm774_vm1, %v1057_v63  ;;  %788 = vst.msk [vmem:[%s1233_s23 + $0x68] sm:$0xff] %vm774_vm1, %v570_v0  ;;  %v698_v1 = vpop.f32.mrb[15].mxu1 }
 0x102   : > { %820 = vst.msk [vmem:[%s1233_s23 + $0x168] sm:$0xff] %vm774_vm1, %v698_v1 }
 0x105   : > { %v1028_v2 = vpop.f32.mrb[16].mxu0 }
 0x106   : > { %793 = vst.msk [vmem:[%s1233_s23 + $0x90] sm:$0xff] %vm774_vm1, %v1028_v2  ;;  %v1060_v3 = vpop.f32.mrb[16].mxu1  ;;  %v583_v4 = vpop.f32.mrb[17].mxu0 }
 0x107   : > { %825 = vst.msk [vmem:[%s1233_s23 + $0x190] sm:$0xff] %vm774_vm1, %v1060_v3  ;;  %791 = vst.msk [vmem:[%s1233_s23 + $0x80] sm:$0xff] %vm774_vm1, %v583_v4  ;;  %v711_v5 = vpop.f32.mrb[17].mxu1  ;;  %v1029_v6 = vpop.f32.mrb[18].mxu0 }
 0x108   : > { %823 = vst.msk [vmem:[%s1233_s23 + $0x180] sm:$0xff] %vm774_vm1, %v711_v5  ;;  %794 = vst.msk [vmem:[%s1233_s23 + $0x98] sm:$0xff] %vm774_vm1, %v1029_v6  ;;  %v1061_v7 = vpop.f32.mrb[18].mxu1  ;;  %v586_v8 = vpop.f32.mrb[19].mxu0 }
 0x109   : > { %826 = vst.msk [vmem:[%s1233_s23 + $0x198] sm:$0xff] %vm774_vm1, %v1061_v7  ;;  %792 = vst.msk [vmem:[%s1233_s23 + $0x88] sm:$0xff] %vm774_vm1, %v586_v8  ;;  %v714_v9 = vpop.f32.mrb[19].mxu1 }
 0x10a   : > { %824 = vst.msk [vmem:[%s1233_s23 + $0x188] sm:$0xff] %vm774_vm1, %v714_v9 }
 0x10d   : > { %v1032_v10 = vpop.f32.mrb[20].mxu0 }
 0x10e   : > { %797 = vst.msk [vmem:[%s1233_s23 + $0xb0] sm:$0xff] %vm774_vm1, %v1032_v10  ;;  %v1064_v11 = vpop.f32.mrb[20].mxu1  ;;  %v599_v12 = vpop.f32.mrb[21].mxu0 }
 0x10f   : > { %829 = vst.msk [vmem:[%s1233_s23 + $0x1b0] sm:$0xff] %vm774_vm1, %v1064_v11  ;;  %795 = vst.msk [vmem:[%s1233_s23 + $0xa0] sm:$0xff] %vm774_vm1, %v599_v12  ;;  %v727_v13 = vpop.f32.mrb[21].mxu1  ;;  %v1033_v14 = vpop.f32.mrb[22].mxu0 }
 0x110   : > { %827 = vst.msk [vmem:[%s1233_s23 + $0x1a0] sm:$0xff] %vm774_vm1, %v727_v13  ;;  %798 = vst.msk [vmem:[%s1233_s23 + $0xb8] sm:$0xff] %vm774_vm1, %v1033_v14  ;;  %v1065_v15 = vpop.f32.mrb[22].mxu1  ;;  %v602_v16 = vpop.f32.mrb[23].mxu0 }
 0x111   : > { %830 = vst.msk [vmem:[%s1233_s23 + $0x1b8] sm:$0xff] %vm774_vm1, %v1065_v15  ;;  %796 = vst.msk [vmem:[%s1233_s23 + $0xa8] sm:$0xff] %vm774_vm1, %v602_v16  ;;  %v730_v17 = vpop.f32.mrb[23].mxu1 }
 0x112   : > { %828 = vst.msk [vmem:[%s1233_s23 + $0x1a8] sm:$0xff] %vm774_vm1, %v730_v17 }
 0x115   : > { %v1036_v18 = vpop.f32.mrb[24].mxu0 }
 0x116   : > { %801 = vst.msk [vmem:[%s1233_s23 + $0xd0] sm:$0xff] %vm774_vm1, %v1036_v18  ;;  %v1068_v19 = vpop.f32.mrb[24].mxu1  ;;  %v615_v20 = vpop.f32.mrb[25].mxu0 }
 0x117   : > { %833 = vst.msk [vmem:[%s1233_s23 + $0x1d0] sm:$0xff] %vm774_vm1, %v1068_v19  ;;  %799 = vst.msk [vmem:[%s1233_s23 + $0xc0] sm:$0xff] %vm774_vm1, %v615_v20  ;;  %v743_v21 = vpop.f32.mrb[25].mxu1  ;;  %v1037_v22 = vpop.f32.mrb[26].mxu0 }
 0x118   : > { %831 = vst.msk [vmem:[%s1233_s23 + $0x1c0] sm:$0xff] %vm774_vm1, %v743_v21  ;;  %802 = vst.msk [vmem:[%s1233_s23 + $0xd8] sm:$0xff] %vm774_vm1, %v1037_v22  ;;  %v1069_v23 = vpop.f32.mrb[26].mxu1  ;;  %v618_v24 = vpop.f32.mrb[27].mxu0 }
 0x119   : > { %834 = vst.msk [vmem:[%s1233_s23 + $0x1d8] sm:$0xff] %vm774_vm1, %v1069_v23  ;;  %800 = vst.msk [vmem:[%s1233_s23 + $0xc8] sm:$0xff] %vm774_vm1, %v618_v24  ;;  %v746_v25 = vpop.f32.mrb[27].mxu1 }
 0x11a   : > { %832 = vst.msk [vmem:[%s1233_s23 + $0x1c8] sm:$0xff] %vm774_vm1, %v746_v25 }
 0x11d   : > { %v1040_v26 = vpop.f32.mrb[28].mxu0 }
 0x11e   : > { %805 = vst.msk [vmem:[%s1233_s23 + $0xf0] sm:$0xff] %vm774_vm1, %v1040_v26  ;;  %v1072_v27 = vpop.f32.mrb[28].mxu1  ;;  %v631_v28 = vpop.f32.mrb[29].mxu0 }
 0x11f   : > { %837 = vst.msk [vmem:[%s1233_s23 + $0x1f0] sm:$0xff] %vm774_vm1, %v1072_v27  ;;  %803 = vst.msk [vmem:[%s1233_s23 + $0xe0] sm:$0xff] %vm774_vm1, %v631_v28  ;;  %v759_v29 = vpop.f32.mrb[29].mxu1  ;;  %v1041_v30 = vpop.f32.mrb[30].mxu0 }
 0x120   : > { %835 = vst.msk [vmem:[%s1233_s23 + $0x1e0] sm:$0xff] %vm774_vm1, %v759_v29  ;;  %806 = vst.msk [vmem:[%s1233_s23 + $0xf8] sm:$0xff] %vm774_vm1, %v1041_v30  ;;  %v1073_v31 = vpop.f32.mrb[30].mxu1  ;;  %v634_v32 = vpop.f32.mrb[31].mxu0 }
 0x121   : > { %838 = vst.msk [vmem:[%s1233_s23 + $0x1f8] sm:$0xff] %vm774_vm1, %v1073_v31  ;;  %804 = vst.msk [vmem:[%s1233_s23 + $0xe8] sm:$0xff] %vm774_vm1, %v634_v32  ;;  %v762_v33 = vpop.f32.mrb[31].mxu1 }
 0x122   : > { %836 = vst.msk [vmem:[%s1233_s23 + $0x1e8] sm:$0xff] %vm774_vm1, %v762_v33 }
 0x123 PF: > { %s12_s9 = sadd.s32 1, %s1126_s9  }
 0x124   : > { %p9_p4 = scmp.ge.s32.totalorder %s12_s9, 4  }
 0x126   :  { %11 = sbr.rel (!%p9_p4) target bundleno = 1 (0x1), region = 58 }

</bundles_post_ra>
